<compile_context>
chip_gen: v6e
topology: v6e:2x2x1
jax: 0.10.0
libtpu: 0.0.40
codegen_flags: <defaults>
</compile_context>

<pallas_src>
import functools

import jax
import jax.numpy as jnp
from jax.experimental import pallas as pl
from jax.experimental.pallas import tpu as pltpu

_LANES = 128  # vreg lane width; preds are packed lane-dense in multiples of this.


def _slope_l1_kernel_const_target(preds_ref, out_ref, *, target, scale):
    """|preds - const_target| -> sum -> scale. Scalar result goes to SMEM."""
    diff = jnp.abs(preds_ref[...] - target)          # (rows, 128) on the VPU
    out_ref[0, 0] = scale * jnp.sum(diff)            # XLU reduce -> scalar -> SMEM


def _slope_l1_kernel_dyn_target(target_ref, preds_ref, out_ref, *, scale):
    """Same as above, but target is a runtime scalar held in SMEM."""
    t = target_ref[0, 0]
    diff = jnp.abs(preds_ref[...] - t)
    out_ref[0, 0] = scale * jnp.sum(diff)


def slope_general_loss(preds, target=None, loss_weight=1.0):
    """JAX/Pallas equivalent of Slope_General(loss_type='L1', reduction='mean').

    `preds` may be a list/tuple of scalar arrays (matching the PyTorch module)
    or an already-packed 1-D array.
    """
    if target is None:
        target = 1.0

    # --- pack preds with a single stack op (no per-element reshape+concat) ---
    if isinstance(preds, (list, tuple)):
        if len(preds) == 0:
            raise ValueError("Slope_General: `preds` must contain at least one element.")
        preds_flat = jnp.stack(list(preds)).astype(jnp.float32).reshape(-1)
    else:
        preds_flat = jnp.asarray(preds, dtype=jnp.float32).reshape(-1)

    n = int(preds_flat.shape[0])
    if n == 0:
        raise ValueError("Slope_General: `preds` must contain at least one element.")

    static_target = isinstance(target, (int, float)) and not isinstance(target, bool)

    # --- lane-dense packing: pad to a multiple of 128 lanes with the target value
    #     so padded |pred - target| contributes exactly 0; divide by the true n. ---
    n_pad = pl.cdiv(n, _LANES) * _LANES
    rows = n_pad // _LANES
    pad = n_pad - n

    if static_target:
        pad_value = jnp.float32(target)
        target_arr = None
    else:
        target_arr = jnp.asarray(target, dtype=jnp.float32).reshape(1, 1)
        pad_value = target_arr[0, 0]

    if pad:
        preds_flat = jnp.concatenate(
            [preds_flat, jnp.full((pad,), pad_value, dtype=jnp.float32)]
        )
    preds2d = preds_flat.reshape(rows, _LANES)

    scale = float(loss_weight) / n

    # TODO(synk): if n ever exceeds a comfortable single VMEM tile, add a grid
    # over rows with a VMEM accumulator and mark that axis "arbitrary" (and an
    # independent axis "parallel" for megacore); not needed for realistic list sizes.
    if static_target:
        kernel = functools.partial(
            _slope_l1_kernel_const_target, target=float(target), scale=scale
        )
        out = pl.pallas_call(
            kernel,
            out_shape=jax.ShapeDtypeStruct((1, 1), jnp.float32),
            in_specs=[pl.BlockSpec(memory_space=pltpu.MemorySpace.VMEM)],     # preds
            out_specs=pl.BlockSpec(memory_space=pltpu.MemorySpace.SMEM),      # scalar out
        )(preds2d)
    else:
        kernel = functools.partial(_slope_l1_kernel_dyn_target, scale=scale)
        out = pl.pallas_call(
            kernel,
            out_shape=jax.ShapeDtypeStruct((1, 1), jnp.float32),
            in_specs=[
                pl.BlockSpec(memory_space=pltpu.MemorySpace.SMEM),            # target
                pl.BlockSpec(memory_space=pltpu.MemorySpace.VMEM),            # preds
            ],
            out_specs=pl.BlockSpec(memory_space=pltpu.MemorySpace.SMEM),      # scalar out
        )(target_arr, preds2d)

    return out[0, 0]


if __name__ == "__main__":
    key = jax.random.PRNGKey(0)
    n = 8  # number of scalar predictions (e.g. per-branch slope estimates)
    keys = jax.random.split(key, n)
    # Each "pred" is a scalar tensor, mirroring the PyTorch list-of-scalars input.
    preds_list = [jax.random.normal(k, ()) for k in keys]
    preds_vec = jnp.stack(preds_list).astype(jnp.float32)

    # 1) Default (constant) target path: target=None -> 1.0 baked into the kernel.
    loss_const = slope_general_loss(preds_list, target=None, loss_weight=1.0)
    loss_const = jax.block_until_ready(loss_const)
    ref_const = jnp.mean(jnp.abs(preds_vec - 1.0))
    assert jnp.allclose(loss_const, ref_const, rtol=1e-6, atol=1e-6), (loss_const, ref_const)

    # 2) Traced-target path: target is a runtime scalar array (goes through SMEM).
    tgt = jnp.float32(0.5)
    loss_dyn = slope_general_loss(preds_list, target=tgt, loss_weight=2.0)
    loss_dyn = jax.block_until_ready(loss_dyn)
    ref_dyn = 2.0 * jnp.mean(jnp.abs(preds_vec - tgt))
    assert jnp.allclose(loss_dyn, ref_dyn, rtol=1e-6, atol=1e-6), (loss_dyn, ref_dyn)

    print("KERNEL_OK")
</pallas_src>

<mosaic_0001>
module attributes {stable_mosaic.version = 11 : i64} {
  func.func @_slope_l1_kernel_const_target(%arg0: memref<1x128xf32, #tpu.memory_space<vmem>>, %arg1: memref<1x1xf32, #tpu.memory_space<smem>>) attributes {dimension_semantics = [], scalar_prefetch = 0 : i64, scratch_operands = 0 : i64, tpu.core_type = #tpu.core_type<tc>} {
    %c0 = arith.constant 0 : index
    %c0_0 = arith.constant 0 : index
    %0 = vector.load %arg0[%c0, %c0_0] : memref<1x128xf32, #tpu.memory_space<vmem>>, vector<1x128xf32>
    %cst = arith.constant 1.000000e+00 : f32
    %1 = vector.broadcast %cst : f32 to vector<1x128xf32>
    %2 = arith.subf %0, %1 : vector<1x128xf32>
    %3 = math.absf %2 : vector<1x128xf32>
    %4 = vector.shape_cast %3 : vector<1x128xf32> to vector<1x1x128xf32>
    %cst_1 = arith.constant dense<0.000000e+00> : vector<1xf32>
    %5 = vector.multi_reduction <add>, %4, %cst_1 [1, 2] : vector<1x1x128xf32> to vector<1xf32>
    %6 = vector.shape_cast %5 : vector<1xf32> to vector<1x1x1xf32>
    %7 = vector.extract %6[0, 0, 0] : f32 from vector<1x1x1xf32>
    %cst_2 = arith.constant 1.250000e-01 : f32
    %8 = arith.mulf %cst_2, %7 : f32
    %c0_3 = arith.constant 0 : index
    %c0_4 = arith.constant 0 : index
    %9 = memref.load %arg1[%c0_3, %c0_4] : memref<1x1xf32, #tpu.memory_space<smem>>
    memref.store %8, %arg1[%c0_3, %c0_4] : memref<1x1xf32, #tpu.memory_space<smem>>
    return
  }
}

</mosaic_0001>

<bundles_post_ra>
// kernel: tpu_custom_call.1
= control target key start
LH: loop header
LB: loop body
LE: loop exit
PB: predicated region body
PF: predicated region fallthrough
CT: control target
= control target key end

     0   :  { %6 = vsyncpa [#allocation3], 0  ;;  %s107_s0 = inlined_call_operand.hbm [shape: f32[1,128], index: 0, kind: input, shape index: {}]   ;;  %s108_s1 = inlined_call_operand.hbm [shape: f32[1,1], index: 1, kind: output, shape index: {}]  }
   0x1   :  { %7 = vsyncpa [#allocation4], 0  ;;  %s89_s6 = smov [#allocation2]  }
   0x2   :  { %s14_s7 = sshll.u32 %s89_s6, 4  ;;  %s15_s7 = int_to_ptr.vmem [resolvable:$true] %s14_s7 }
   0x3   :  { %s65_s8 = scalar_lea.vmem %s15_s7, 16  ;;  %s69_s9 = scalar_lea.vmem %s15_s7, 32 }
   0x4   :  { %p66_p0 = scmp.ne.s32.totalorder %s15_s7, %s65_s8  ;;  %p70_p1 = scmp.lt.s32.totalorder %s15_s7, %s15_s7 }
   0x5   :  { %p71_p2 = scmp.lt.s32.totalorder %s69_s9, %s65_s8 }
   0x7   :  { %p72_p3 = por %p71_p2, %p70_p1 }
   0x9   :  { %p73_p4 = pnand %p72_p3, %p66_p0 }
   0xb   :  { %76 = shalt.err (!%p73_p4)
}
   0xc   :  { %17 = dma.hbm_to_vmem [thread:$0]  %s107_s0, 16, %s15_s7, [#allocation3]  }
   0xd   :  { %85 = dma.done.wait [#allocation3], 16  }
   0xe   :  { %86 = vsyncadd [#allocation3], 4294967280  ;;  %v21_v0 = vld [vmem:[#allocation2] sm:$0x1]  ;;  %vm24_vm0 = vcmask 1040384   ;;  %s90_s0 = smov [#allocation5]  }
   0xf   :  { %v52_v1 = vadd.f32 -1.0, %v21_v0 }
  0x11   :  { %v23_v2 = vand.u32 2147483647, %v52_v1 }
  0x13   :  { %v25_v3 = vsel %vm24_vm0, %v23_v2, 0.0 }
  0x14   :  { %26 = vadd.xlane.f32.xlu0 %v25_v3 }
  0x9d   :  { %v27_v4 = vpop.xlane.xlu0 %26 }
  0x9e   :  { %v28_v5 = vrot.slane %v27_v4, 4 }
  0xa0   :  { %v29_v6 = vadd.f32 %v28_v5, %v27_v4 }
  0xa2   :  { %v30_v7 = vrot.slane %v29_v6, 2 }
  0xa4   :  { %v31_v8 = vadd.f32 %v30_v7, %v29_v6 }
  0xa6   :  { %v32_v9 = vrot.slane %v31_v8, 1 }
  0xa8   :  { %v33_v10 = vadd.f32 %v32_v9, %v31_v8 }
  0xaa   :  { %53 = vpush %v33_v10 }
  0xdb   :  { %s54_s12 = spop %53 }
  0xdc   :  { %s35_s13 = smul.f32 0.125, %s54_s12 }
  0xde   :  { %37 = sst [smem:[#allocation5]] %s35_s13 }
  0xdf   :  { %45 = dma.smem_to_hbm %s90_s0, 16, %s108_s1, [#allocation4]  }
  0xe0   :  { %87 = dma.done.wait [#allocation4], 16  }
  0xe1   :  { %88 = vsyncadd [#allocation4], 4294967280 }
  0xe2   :  { %49 = sfence }
  0xe3   :  { %50 = vsyncpa [#allocation3], 1 }
  0xe4   :  { %51 = vsyncpa [#allocation4], 1 }

</bundles_post_ra>
